<compile_context>
chip_gen: v7x
topology: tpu7x:2x2x1
jax: 0.10.0
libtpu: 0.0.40
codegen_flags: <defaults>
</compile_context>

<pallas_src>
import math

import jax
import jax.numpy as jnp
from jax.experimental import pallas as pl
from jax.experimental.pallas import tpu as pltpu


# ----------------------------------------------------------------------------
# Shared in-kernel tail: packed hidden layers + last layer + pairwise product
# ----------------------------------------------------------------------------
def _packed_tail(h, w_refs, idx, n_hidden, order, dim):
    """h: (TB, N) f32 post-ReLU activations after layer 0."""
    for _ in range(n_hidden):
        wl_ref, bl_ref = w_refs[idx], w_refs[idx + 1]
        idx += 2
        h = jnp.dot(h.astype(jnp.bfloat16), wl_ref[...],
                    preferred_element_type=jnp.float32) + bl_ref[...]
        h = jnp.maximum(h, 0.0)

    wl_ref, bl_ref = w_refs[idx], w_refs[idx + 1]
    z = jnp.dot(h.astype(jnp.bfloat16), wl_ref[...],
                preferred_element_type=jnp.float32) + bl_ref[...]

    # Left half lanes  per k: [mlp1_k | mlp2_k]
    # Right half lanes per k: [ ms_k  |  ts_k ]
    half = order * dim
    prod = z[:, :half] * z[:, half:2 * half]        # (TB, order*dim)
    acc = prod[:, 0:dim]
    for k in range(1, order):
        acc = acc + prod[:, k * dim:(k + 1) * dim]
    return acc                                       # (TB, dim) = [o1 | o2]


# ----------------------------------------------------------------------------
# Kernels
# ----------------------------------------------------------------------------
def make_forward_kernel(n_hidden, order, dim):
    """One batch-tile forward: 3 packed matmuls + VPU pairwise product/reduce."""

    def kernel(xaug_ref, *rest):
        out_ref = rest[-1]
        w = rest[:-1]
        # Layer 0: x_aug = [x | t | 1]  (f32)  @  w0_aug = [Wx ; w_t ; b] (f32)
        h = jnp.dot(xaug_ref[...], w[0][...], preferred_element_type=jnp.float32)
        h = jnp.maximum(h, 0.0)
        acc = _packed_tail(h, w, 1, n_hidden, order, dim)
        out_ref[...] = acc.astype(out_ref.dtype)

    return kernel


def make_sampler_kernel(n_hidden, order, dim, n_steps):
    """FlowNet.sample(): n_steps Euler steps on a resident VMEM state.

    Grid = (batch_tiles [parallel], n_steps [arbitrary]).  Weights are resident
    (constant block index), x0 is DMA'd once per batch tile, the state lives in
    a VMEM scratch, and the output is written only on the last step.
    """
    dt = 1.0 / n_steps

    def kernel(x0_ref, *rest):
        xs_ref = rest[-1]          # VMEM scratch: resident ODE state (TB, dim) f32
        out_ref = rest[-2]
        w = rest[:-2]
        step = pl.program_id(1)

        @pl.when(step == 0)
        def _init():
            xs_ref[...] = x0_ref[...].astype(jnp.float32)

        xcur = xs_ref[...]                           # (TB, dim) f32
        t = step.astype(jnp.float32) * dt            # scalar t = i * dt
        w0 = w[0][...]                               # (dim+2, N) f32 = [Wx ; w_t ; b]
        h = jnp.dot(xcur, w0[:dim, :], preferred_element_type=jnp.float32)
        h = h + t * w0[dim:dim + 1, :] + w0[dim + 1:dim + 2, :]
        h = jnp.maximum(h, 0.0)
        v = _packed_tail(h, w, 1, n_hidden, order, dim)

        xnew = xcur + dt * v
        xs_ref[...] = xnew

        @pl.when(step == n_steps - 1)
        def _finalize():
            out_ref[...] = xnew.astype(out_ref.dtype)

    return kernel


# ----------------------------------------------------------------------------
# Wrappers
# ----------------------------------------------------------------------------
def _round_up(n, m):
    return ((n + m - 1) // m) * m


def _choose_tile_b(B):
    # >= 256 rows fills the 2x256 MXU (v6e/v7x) and is 2x the v5e MXU height;
    # small batches fall back to one sublane-aligned tile.
    if B >= 512:
        return 512
    if B >= 256:
        return 256
    return max(8, _round_up(B, 8))


def _vmem_limit_bytes(packed, tile_b, dim):
    w_bytes = sum(int(w.size) * int(w.dtype.itemsize) for w in packed)
    io_bytes = tile_b * (dim + 2) * 4 + tile_b * dim * 4
    budget = 2 * w_bytes + 4 * io_bytes + (8 << 20)   # headroom for internal scratch
    return int(min(max(budget, 16 << 20), 64 << 20))


def mlp_nvp_flow_forward(x, t, packed_weights, *, dim, order, n_layers_total):
    """MLPNVPFlow.forward(x, t) as one pallas_call with a parallel batch grid."""
    B = x.shape[0]
    n_hidden = n_layers_total - 2
    tile_b = _choose_tile_b(B)
    b_pad = _round_up(B, tile_b)

    # Fold t and the layer-0 bias into the first matmul: x_aug = [x | t | 1].
    x_aug = jnp.concatenate(
        [x.astype(jnp.float32), t.astype(jnp.float32),
         jnp.ones((B, 1), jnp.float32)], axis=1)
    if b_pad != B:
        x_aug = jnp.pad(x_aug, ((0, b_pad - B), (0, 0)))

    kernel = make_forward_kernel(n_hidden, order, dim)
    in_specs = [pl.BlockSpec((tile_b, dim + 2), lambda b: (b, 0))]
    in_specs += [pl.BlockSpec(tuple(w.shape), lambda b: (0, 0))  # weights resident
                 for w in packed_weights]
    out_specs = pl.BlockSpec((tile_b, dim), lambda b: (b, 0))

    out = pl.pallas_call(
        kernel,
        out_shape=jax.ShapeDtypeStruct((b_pad, dim), x.dtype),
        grid_spec=pltpu.PrefetchScalarGridSpec(
            num_scalar_prefetch=0, grid=(b_pad // tile_b,),
            in_specs=in_specs, out_specs=out_specs),
        compiler_params=pltpu.CompilerParams(
            dimension_semantics=("parallel",),
            vmem_limit_bytes=_vmem_limit_bytes(packed_weights, tile_b, dim)),
    )(x_aug, *packed_weights)
    return out[:B]


def mlp_nvp_flow_sample(x0, packed_weights, *, n_steps, dim, order, n_layers_total):
    """FlowNet.sample(): n_steps Euler steps fused into ONE pallas_call."""
    B = x0.shape[0]
    n_hidden = n_layers_total - 2
    tile_b = _choose_tile_b(B)
    b_pad = _round_up(B, tile_b)

    x0f = x0.astype(jnp.float32)
    if b_pad != B:
        x0f = jnp.pad(x0f, ((0, b_pad - B), (0, 0)))

    kernel = make_sampler_kernel(n_hidden, order, dim, n_steps)
    in_specs = [pl.BlockSpec((tile_b, dim), lambda b, s: (b, 0))]
    in_specs += [pl.BlockSpec(tuple(w.shape), lambda b, s: (0, 0))
                 for w in packed_weights]
    out_specs = pl.BlockSpec((tile_b, dim), lambda b, s: (b, 0))

    out = pl.pallas_call(
        kernel,
        out_shape=jax.ShapeDtypeStruct((b_pad, dim), x0.dtype),
        grid_spec=pltpu.PrefetchScalarGridSpec(
            num_scalar_prefetch=0,
            grid=(b_pad // tile_b, n_steps),
            in_specs=in_specs, out_specs=out_specs,
            scratch_shapes=[pltpu.VMEM((tile_b, dim), jnp.float32)]),
        compiler_params=pltpu.CompilerParams(
            dimension_semantics=("parallel", "arbitrary"),
            vmem_limit_bytes=_vmem_limit_bytes(packed_weights, tile_b, dim)),
    )(x0f, *packed_weights)
    return out[:B]


# ----------------------------------------------------------------------------
# Parameter init (PyTorch nn.Linear-style) and block-diagonal packing
# ----------------------------------------------------------------------------
def init_params(key, dim, hidden_dim_s, hidden_layer_number, order):
    """Per-group list of L layers; each layer is (Wt (order,in,out), b (order,1,out))."""
    d2 = dim // 2
    L = hidden_layer_number + 1
    groups = (("mlp1", d2), ("mlp2", d2), ("ms", d2 + 1), ("ts", d2 + 1))
    params = {}
    for name, in0 in groups:
        layer_in = [in0] + [hidden_dim_s] * (L - 1)
        layer_out = [hidden_dim_s] * (L - 1) + [d2]
        layers = []
        for l in range(L):
            wts, bs = [], []
            for _ in range(order):
                key, k1, k2 = jax.random.split(key, 3)
                bound = 1.0 / math.sqrt(layer_in[l])
                W = jax.random.uniform(k1, (layer_out[l], layer_in[l]),
                                       jnp.float32, -bound, bound)
                b = jax.random.uniform(k2, (layer_out[l],),
                                       jnp.float32, -bound, bound)
                wts.append(W.T)            # (in, out)
                bs.append(b[None, :])      # (1, out)
            layers.append((jnp.stack(wts, 0), jnp.stack(bs, 0)))
        params[name] = layers
    return params


def pack_params(params, *, dim, hidden_dim, order, n_layers_total):
    """Block-diagonal pack of (4 groups x order) MLPs into 3 wide layers.

    Layer 0 is packed for the augmented input [x | t | 1] -> (dim+2, N) in f32;
    hidden / last layers are bf16 weights with f32 biases.
    """
    d2 = dim // 2
    H = hidden_dim
    N = 4 * order * H
    out_w = 2 * order * dim
    n_hidden = n_layers_total - 2
    groups = ("mlp1", "mlp2", "ms", "ts")

    w0 = jnp.zeros((dim + 2, N), jnp.float32)          # rows: x(dim), t, 1(bias)
    hidden_ws = [jnp.zeros((N, N), jnp.float32) for _ in range(n_hidden)]
    hidden_bs = [jnp.zeros((1, N), jnp.float32) for _ in range(n_hidden)]
    w_last = jnp.zeros((N, out_w), jnp.float32)
    b_last = jnp.zeros((1, out_w), jnp.float32)

    for g, name in enumerate(groups):
        layers = params[name]
        for k in range(order):
            j = g * order + k
            c0, c1 = j * H, (j + 1) * H

            # --- layer 0 (folded t / bias rows) ---
            wt0 = layers[0][0][k]          # (in0, H)
            bb0 = layers[0][1][k]          # (1, H)
            if name == "mlp1":             # input xa
                w0 = w0.at[0:d2, c0:c1].set(wt0)
            elif name == "mlp2":           # input xb
                w0 = w0.at[d2:dim, c0:c1].set(wt0)
            elif name == "ms":             # input [xb, t]
                w0 = w0.at[d2:dim, c0:c1].set(wt0[:d2])
                w0 = w0.at[dim, c0:c1].set(wt0[d2])
            else:                          # "ts": input [xa, t]
                w0 = w0.at[0:d2, c0:c1].set(wt0[:d2])
                w0 = w0.at[dim, c0:c1].set(wt0[d2])
            w0 = w0.at[dim + 1, c0:c1].set(bb0[0])     # bias row (x_aug "1" column)

            # --- hidden layers (block diagonal) ---
            for li in range(1, n_layers_total - 1):
                wtl = layers[li][0][k]     # (H, H)
                bbl = layers[li][1][k]     # (1, H)
                hidden_ws[li - 1] = hidden_ws[li - 1].at[c0:c1, c0:c1].set(wtl)
                hidden_bs[li - 1] = hidden_bs[li - 1].at[:, c0:c1].set(bbl)

            # --- last layer: route each block to its paired output lanes ---
            wtL = layers[-1][0][k]         # (H, d2)
            bbL = layers[-1][1][k]         # (1, d2)
            if name == "mlp1":
                o0 = k * dim
            elif name == "mlp2":
                o0 = k * dim + d2
            elif name == "ms":
                o0 = order * dim + k * dim
            else:
                o0 = order * dim + k * dim + d2
            w_last = w_last.at[c0:c1, o0:o0 + d2].set(wtL)
            b_last = b_last.at[:, o0:o0 + d2].set(bbL)

    packed = [w0]                                       # layer 0 stays f32
    for wl, bl in zip(hidden_ws, hidden_bs):
        packed += [wl.astype(jnp.bfloat16), bl]
    packed += [w_last.astype(jnp.bfloat16), b_last]
    return packed


# ----------------------------------------------------------------------------
# Pure-JAX references (mirror the PyTorch forward / sample in f32)
# ----------------------------------------------------------------------------
def reference_forward(x, t, params, *, dim, order, n_layers_total):
    d2 = dim // 2
    xa, xb = x[:, :d2], x[:, d2:]
    x1 = jnp.concatenate([xa, t], axis=1)
    x2 = jnp.concatenate([xb, t], axis=1)

    def run(layers, k, xin):
        h = xin
        for l, (wt, b) in enumerate(layers):
            h = h @ wt[k] + b[k]
            if l < n_layers_total - 1:
                h = jnp.maximum(h, 0.0)
        return h

    o1 = jnp.zeros((x.shape[0], d2), jnp.float32)
    o2 = jnp.zeros((x.shape[0], d2), jnp.float32)
    for k in range(order):
        o1 = o1 + run(params["mlp1"], k, xa) * run(params["ms"], k, x2)
        o2 = o2 + run(params["mlp2"], k, xb) * run(params["ts"], k, x1)
    return jnp.concatenate([o1, o2], axis=1)


def reference_sample(x0, params, *, n_steps, dim, order, n_layers_total):
    dt = 1.0 / n_steps
    xs = x0.astype(jnp.float32)
    for i in range(n_steps):
        t = jnp.full((x0.shape[0], 1), i * dt, jnp.float32)
        xs = xs + dt * reference_forward(xs, t, params, dim=dim, order=order,
                                         n_layers_total=n_layers_total)
    return xs


# ----------------------------------------------------------------------------
if __name__ == "__main__":
    dim = 8                    # -> dim // 2 = 4 per coupling half
    hidden_dim_s = 32
    hidden_layer_number = 2    # -> 3 Linear layers per sub-MLP
    order = 2
    n_layers_total = hidden_layer_number + 1

    key = jax.random.PRNGKey(0)
    key, kx, kt, kp, kx2 = jax.random.split(key, 5)

    params = init_params(kp, dim, hidden_dim_s, hidden_layer_number, order)
    packed = pack_params(params, dim=dim, hidden_dim=hidden_dim_s,
                         order=order, n_layers_total=n_layers_total)

    # --- small forward (B=8 -> single batch tile) ---
    batch = 8
    x = jax.random.normal(kx, (batch, dim), jnp.float32)
    t = jax.random.uniform(kt, (batch, 1), jnp.float32)
    out = mlp_nvp_flow_forward(x, t, packed, dim=dim, order=order,
                               n_layers_total=n_layers_total)
    out = jax.block_until_ready(out)
    ref = reference_forward(x, t, params, dim=dim, order=order,
                            n_layers_total=n_layers_total)
    assert out.shape == x.shape and out.dtype == x.dtype
    assert jnp.allclose(out, ref, atol=5e-2, rtol=5e-2), \
        float(jnp.max(jnp.abs(out - ref)))

    # --- batched forward (B=512 -> two 256-row parallel tiles, weights resident) ---
    batch_l = 512
    xl = jax.random.normal(kx2, (batch_l, dim), jnp.float32)
    tl = jnp.full((batch_l, 1), 0.37, jnp.float32)
    out_l = jax.block_until_ready(
        mlp_nvp_flow_forward(xl, tl, packed, dim=dim, order=order,
                             n_layers_total=n_layers_total))
    ref_l = reference_forward(xl, tl, params, dim=dim, order=order,
                              n_layers_total=n_layers_total)
    assert out_l.shape == xl.shape
    assert jnp.allclose(out_l, ref_l, atol=5e-2, rtol=5e-2), \
        float(jnp.max(jnp.abs(out_l - ref_l)))

    # --- fused ODE sampler: 32 Euler steps in ONE pallas_call ---
    n_steps = 32
    xs = jax.block_until_ready(
        mlp_nvp_flow_sample(x, packed, n_steps=n_steps, dim=dim, order=order,
                            n_layers_total=n_layers_total))
    xs_ref = reference_sample(x, params, n_steps=n_steps, dim=dim, order=order,
                              n_layers_total=n_layers_total)
    assert xs.shape == x.shape
    assert jnp.allclose(xs, xs_ref, atol=5e-2, rtol=5e-2), \
        float(jnp.max(jnp.abs(xs - xs_ref)))

    # TODO(synk): MLPNVPFlow.divergence() raises NotImplementedError in the
    # reference module, so no kernel is provided for it.
    print("KERNEL_OK")
</pallas_src>

<mosaic_0001>
module attributes {stable_mosaic.version = 11 : i64} {
  func.func @kernel(%arg0: i32, %arg1: memref<8x10xf32, #tpu.memory_space<vmem>>, %arg2: memref<10x256xf32, #tpu.memory_space<vmem>>, %arg3: memref<256x256xbf16, #tpu.memory_space<vmem>>, %arg4: memref<1x256xf32, #tpu.memory_space<vmem>>, %arg5: memref<256x32xbf16, #tpu.memory_space<vmem>>, %arg6: memref<1x32xf32, #tpu.memory_space<vmem>>, %arg7: memref<8x8xf32, #tpu.memory_space<vmem>>) attributes {dimension_semantics = [#tpu.dimension_semantics<parallel>], iteration_bounds = array<i64: 1>, scalar_prefetch = 0 : i64, scratch_operands = 0 : i64, tpu.core_type = #tpu.core_type<tc>, window_params = [{transform_indices = @transform_0, window_bounds = array<i64: 8, 10>}, {pipeline_mode = #tpu.pipeline_mode<synchronous>, transform_indices = @transform_1, window_bounds = array<i64: 10, 256>}, {pipeline_mode = #tpu.pipeline_mode<synchronous>, transform_indices = @transform_2, window_bounds = array<i64: 256, 256>}, {pipeline_mode = #tpu.pipeline_mode<synchronous>, transform_indices = @transform_3, window_bounds = array<i64: 1, 256>}, {pipeline_mode = #tpu.pipeline_mode<synchronous>, transform_indices = @transform_4, window_bounds = array<i64: 256, 32>}, {pipeline_mode = #tpu.pipeline_mode<synchronous>, transform_indices = @transform_5, window_bounds = array<i64: 1, 32>}, {transform_indices = @transform_6, window_bounds = array<i64: 8, 8>}]} {
    %c0 = arith.constant 0 : index
    %c0_0 = arith.constant 0 : index
    %0 = vector.load %arg1[%c0, %c0_0] : memref<8x10xf32, #tpu.memory_space<vmem>>, vector<8x10xf32>
    %c0_1 = arith.constant 0 : index
    %c0_2 = arith.constant 0 : index
    %1 = vector.load %arg2[%c0_1, %c0_2] : memref<10x256xf32, #tpu.memory_space<vmem>>, vector<10x256xf32>
    %cst = arith.constant dense<0.000000e+00> : vector<8x256xf32>
    %2 = tpu.matmul %0, %1, %cst {dimension_numbers = #tpu.dot_dimension_numbers<[1], [0], [0], [1], [0, 0, 1, 1], [], []>} : vector<8x10xf32>, vector<10x256xf32>, vector<8x256xf32> -> vector<8x256xf32>
    %cst_3 = arith.constant 0.000000e+00 : f32
    %3 = vector.broadcast %cst_3 : f32 to vector<8x256xf32>
    %4 = arith.maximumf %2, %3 : vector<8x256xf32>
    %5 = arith.truncf %4 : vector<8x256xf32> to vector<8x256xbf16>
    %c0_4 = arith.constant 0 : index
    %c0_5 = arith.constant 0 : index
    %6 = vector.load %arg3[%c0_4, %c0_5] : memref<256x256xbf16, #tpu.memory_space<vmem>>, vector<256x256xbf16>
    %cst_6 = arith.constant dense<0.000000e+00> : vector<8x256xf32>
    %7 = tpu.matmul %5, %6, %cst_6 {dimension_numbers = #tpu.dot_dimension_numbers<[1], [0], [0], [1], [0, 0, 1, 1], [], []>} : vector<8x256xbf16>, vector<256x256xbf16>, vector<8x256xf32> -> vector<8x256xf32>
    %c0_7 = arith.constant 0 : index
    %c0_8 = arith.constant 0 : index
    %8 = vector.load %arg4[%c0_7, %c0_8] : memref<1x256xf32, #tpu.memory_space<vmem>>, vector<1x256xf32>
    %9 = vector.broadcast %8 : vector<1x256xf32> to vector<8x256xf32>
    %10 = arith.addf %7, %9 : vector<8x256xf32>
    %cst_9 = arith.constant 0.000000e+00 : f32
    %11 = vector.broadcast %cst_9 : f32 to vector<8x256xf32>
    %12 = arith.maximumf %10, %11 : vector<8x256xf32>
    %13 = arith.truncf %12 : vector<8x256xf32> to vector<8x256xbf16>
    %c0_10 = arith.constant 0 : index
    %c0_11 = arith.constant 0 : index
    %14 = vector.load %arg5[%c0_10, %c0_11] : memref<256x32xbf16, #tpu.memory_space<vmem>>, vector<256x32xbf16>
    %cst_12 = arith.constant dense<0.000000e+00> : vector<8x32xf32>
    %15 = tpu.matmul %13, %14, %cst_12 {dimension_numbers = #tpu.dot_dimension_numbers<[1], [0], [0], [1], [0, 0, 1, 1], [], []>} : vector<8x256xbf16>, vector<256x32xbf16>, vector<8x32xf32> -> vector<8x32xf32>
    %c0_13 = arith.constant 0 : index
    %c0_14 = arith.constant 0 : index
    %16 = vector.load %arg6[%c0_13, %c0_14] : memref<1x32xf32, #tpu.memory_space<vmem>>, vector<1x32xf32>
    %17 = vector.broadcast %16 : vector<1x32xf32> to vector<8x32xf32>
    %18 = arith.addf %15, %17 : vector<8x32xf32>
    %19 = vector.extract_strided_slice %18 {offsets = [0, 0], sizes = [8, 16], strides = [1, 1]} : vector<8x32xf32> to vector<8x16xf32>
    %20 = vector.extract_strided_slice %18 {offsets = [0, 16], sizes = [8, 16], strides = [1, 1]} : vector<8x32xf32> to vector<8x16xf32>
    %21 = arith.mulf %19, %20 : vector<8x16xf32>
    %22 = vector.extract_strided_slice %21 {offsets = [0, 0], sizes = [8, 8], strides = [1, 1]} : vector<8x16xf32> to vector<8x8xf32>
    %23 = vector.extract_strided_slice %21 {offsets = [0, 8], sizes = [8, 8], strides = [1, 1]} : vector<8x16xf32> to vector<8x8xf32>
    %24 = arith.addf %22, %23 : vector<8x8xf32>
    %c0_15 = arith.constant 0 : index
    %c0_16 = arith.constant 0 : index
    %25 = vector.load %arg7[%c0_15, %c0_16] : memref<8x8xf32, #tpu.memory_space<vmem>>, vector<8x8xf32>
    tpu.vector_store %arg7[%c0_15, %c0_16], %24 {strides = array<i32>} : memref<8x8xf32, #tpu.memory_space<vmem>>, vector<8x8xf32>,
    return
  }
  func.func @transform_0(%arg0: i32) -> (i32, i32) {
    %c0_i32 = arith.constant 0 : i32
    %c0_i32_0 = arith.constant 0 : i32
    return %arg0, %c0_i32 : i32, i32
  }
  func.func @transform_1(%arg0: i32) -> (i32, i32) {
    %c0_i32 = arith.constant 0 : i32
    %c0_i32_0 = arith.constant 0 : i32
    %c0_i32_1 = arith.constant 0 : i32
    return %c0_i32, %c0_i32_0 : i32, i32
  }
  func.func @transform_2(%arg0: i32) -> (i32, i32) {
    %c0_i32 = arith.constant 0 : i32
    %c0_i32_0 = arith.constant 0 : i32
    %c0_i32_1 = arith.constant 0 : i32
    return %c0_i32, %c0_i32_0 : i32, i32
  }
  func.func @transform_3(%arg0: i32) -> (i32, i32) {
    %c0_i32 = arith.constant 0 : i32
    %c0_i32_0 = arith.constant 0 : i32
    %c0_i32_1 = arith.constant 0 : i32
    return %c0_i32, %c0_i32_0 : i32, i32
  }
  func.func @transform_4(%arg0: i32) -> (i32, i32) {
    %c0_i32 = arith.constant 0 : i32
    %c0_i32_0 = arith.constant 0 : i32
    %c0_i32_1 = arith.constant 0 : i32
    return %c0_i32, %c0_i32_0 : i32, i32
  }
  func.func @transform_5(%arg0: i32) -> (i32, i32) {
    %c0_i32 = arith.constant 0 : i32
    %c0_i32_0 = arith.constant 0 : i32
    %c0_i32_1 = arith.constant 0 : i32
    return %c0_i32, %c0_i32_0 : i32, i32
  }
  func.func @transform_6(%arg0: i32) -> (i32, i32) {
    %c0_i32 = arith.constant 0 : i32
    %c0_i32_0 = arith.constant 0 : i32
    return %arg0, %c0_i32 : i32, i32
  }
}

</mosaic_0001>

<bundles_post_ra>
// kernel: tpu_custom_call.1
= control target key start
LH: loop header
LB: loop body
LE: loop exit
PB: predicated region body
PF: predicated region fallthrough
CT: control target
= control target key end

     0   :  { %11 = vsyncpa [#allocation3], 0  ;;  %s917_s0 = inlined_call_operand.vmem [shape: f32[8,10], index: 0, kind: input, shape index: {}]   ;;  %s918_s1 = inlined_call_operand.vmem [shape: f32[10,256], index: 1, kind: input, shape index: {}]   ;;  %s919_s2 = inlined_call_operand.hbm [shape: bf16[256,256], index: 2, kind: input, shape index: {}]   ;;  %s920_s3 = inlined_call_operand.vmem [shape: f32[1,256], index: 3, kind: input, shape index: {}]   ;;  %s921_s4 = inlined_call_operand.vmem [shape: bf16[256,32], index: 4, kind: input, shape index: {}]   ;;  %s922_s5 = inlined_call_operand.vmem [shape: f32[1,32], index: 5, kind: input, shape index: {}]   ;;  %s923_s6 = inlined_call_operand.hbm [shape: f32[8,8], index: 6, kind: output, shape index: {}]  }
   0x1   :  { %12 = vsyncpa [#allocation4], 0  ;;  %s781_s21 = smov [#allocation2]   ;;  %s733_s25 = scalar_lea.hbm %s919_s2, 4096 }
   0x2   :  { %s22_s22 = sshll.u32 %s781_s21, 4  ;;  %p734_p0 = scmp.ne.s32.totalorder %s919_s2, %s733_s25  ;;  %s23_s22 = int_to_ptr.vmem [resolvable:$true] %s22_s22 }
   0x3   :  { %p737_p1 = scmp.lt.u32.totalorder %s733_s25, %s919_s2 }
   0x5   :  { %p739_p2 = pnand %p737_p1, %p734_p0 }
   0x7   :  { %742 = shalt.err (!%p739_p2)
}
   0x8   :  { %s743_s30 = scalar_lea.vmem %s23_s22, 4096  ;;  %p748_p4 = scmp.lt.s32.totalorder %s23_s22, %s23_s22 }
   0x9   :  { %p744_p3 = scmp.ne.s32.totalorder %s23_s22, %s743_s30  ;;  %p749_p5 = scmp.lt.s32.totalorder %s743_s30, %s743_s30 }
   0xb   :  { %p750_p6 = por %p749_p5, %p748_p4 }
   0xd   :  { %p751_p7 = pnand %p750_p6, %p744_p3 }
   0xf   :  { %754 = shalt.err (!%p751_p7)
}
  0x10   :  { %s782_s7 = smov 128   ;;  %s783_s8 = smov 8  }
  0x11   :  { %28 = dma.hbm_to_vmem [thread:$0]  %s919_s2, 4096, %s23_s22, [#allocation3], %s782_s7, %s782_s7, %s783_s8  }
  0x12   :  { %777 = dma.done.wait [#allocation3], 4096  }
  0x13   :  { %778 = vsyncadd [#allocation3], 4294963200  ;;  %v784_v0 = vmov 0.0   ;;  %vm48_vm0 = vcmask 1041408   ;;  %vm785_vm1 = vmmov 1   ;;  %v41_v1 = vld [vmem:[%s918_s1 + $0x8] sm:$0xff]  ;;  %v164_v62 = vlaneseq }
  0x14   :  { %119 = vmatprep.mubr.f32.mxu0 %v784_v0  ;;  %vm656_vm2 = vmpackc.low %vm48_vm0, %vm785_vm1  ;;  %v43_v2 = vld [vmem:[%s918_s1 + $0x18] sm:$0x3]  ;;  %v40_v3 = vld [vmem:[%s918_s1] sm:$0xff]  ;;  %vm44_vm3 = vcmask 80896   ;;  %s787_s26 = smov 120   ;;  %s788_s27 = smov [#allocation5]  }
  0x15   :  { %v655_v4 = vpack.c.bf16 %v43_v2, %v41_v1  ;;  %v42_v5 = vld [vmem:[%s918_s1 + $0x10] sm:$0x3]  ;;  %v669_v7 = vld [vmem:[#allocation2 + $0x4] ss:$8 sps:$4 sm:$0xff]   ;;  %v671_v8 = vld [vmem:[#allocation2] ss:$8 sps:$4 sm:$0xff]  }
  0x16   :  { %v658_v6 = vpack.c.bf16 %v42_v5, %v40_v3  ;;  %v672_v9 = vld [vmem:[#allocation2 + $0x14] ss:$8 sps:$4 sm:$0xff]   ;;  %v39_v10 = vld [vmem:[%s917_s0] sm:$0xff]  ;;  %334 = vmatprep.subr.bf16.mxu1 %v669_v7  ;;  %v674_v11 = vld [vmem:[#allocation2 + $0x10] ss:$8 sps:$4 sm:$0xff]   ;;  %v165_v63 = vshrl.u32 %v164_v62, 7 }
  0x17   :  { %657 = vmatprep.subr.msk.bf16.mxu0 %vm656_vm2, %v655_v4  ;;  %335 = vmatpush1.bf16.msra.mxu1 %v671_v8  ;;  %v675_v12 = vld [vmem:[#allocation2 + $0x24] ss:$8 sps:$4 sm:$0xff]   ;;  %v677_v13 = vld [vmem:[#allocation2 + $0x20] ss:$8 sps:$4 sm:$0xff]   ;;  %v678_v14 = vld [vmem:[#allocation2 + $0x34] ss:$8 sps:$4 sm:$0xff]  }
  0x18   :  { %660 = vmatpush1.bf16.msk.msra.mxu0 %vm656_vm2, %v658_v6  ;;  %336 = vmatprep.subr.bf16.mxu1 %v672_v9  ;;  %v680_v15 = vld [vmem:[#allocation2 + $0x30] ss:$8 sps:$4 sm:$0xff]   ;;  %v681_v16 = vld [vmem:[#allocation2 + $0x44] ss:$8 sps:$4 sm:$0xff]   ;;  %v683_v17 = vld [vmem:[#allocation2 + $0x40] ss:$8 sps:$4 sm:$0xff]  }
  0x19   :  { %v684_v18 = vld [vmem:[#allocation2 + $0x54] ss:$8 sps:$4 sm:$0xff]   ;;  %v686_v19 = vld [vmem:[#allocation2 + $0x50] ss:$8 sps:$4 sm:$0xff]   ;;  %v687_v20 = vld [vmem:[#allocation2 + $0x64] ss:$8 sps:$4 sm:$0xff]  }
  0x1a   :  { %v689_v21 = vld [vmem:[#allocation2 + $0x60] ss:$8 sps:$4 sm:$0xff]   ;;  %v690_v22 = vld [vmem:[#allocation2 + $0x74] ss:$8 sps:$4 sm:$0xff]   ;;  %v692_v23 = vld [vmem:[#allocation2 + $0x70] ss:$8 sps:$4 sm:$0xff]  }
  0x1b   :  { %583 = vmatmul.mubr.msk.f32.vlgmr.msra.gmra.mrb[0].mxu0 %vm44_vm3, %v39_v10  ;;  %337 = vmatpush1.bf16.msra.mxu1 %v674_v11  ;;  %v693_v24 = vld [vmem:[#allocation2 + $0x84] ss:$8 sps:$4 sm:$0xff]   ;;  %v695_v25 = vld [vmem:[#allocation2 + $0x80] ss:$8 sps:$4 sm:$0xff]   ;;  %v696_v26 = vld [vmem:[#allocation2 + $0x94] ss:$8 sps:$4 sm:$0xff]  }
  0x1c   :  { %338 = vmatprep.subr.bf16.mxu1 %v675_v12  ;;  %v698_v27 = vld [vmem:[#allocation2 + $0x90] ss:$8 sps:$4 sm:$0xff]   ;;  %v699_v28 = vld [vmem:[#allocation2 + $0xa4] ss:$8 sps:$4 sm:$0xff]   ;;  %v701_v29 = vld [vmem:[#allocation2 + $0xa0] ss:$8 sps:$4 sm:$0xff]  }
  0x1d   :  { %v702_v30 = vld [vmem:[#allocation2 + $0xb4] ss:$8 sps:$4 sm:$0xff]   ;;  %v704_v31 = vld [vmem:[#allocation2 + $0xb0] ss:$8 sps:$4 sm:$0xff]   ;;  %v705_v32 = vld [vmem:[#allocation2 + $0xc4] ss:$8 sps:$4 sm:$0xff]  }
  0x1e   :  { %v707_v33 = vld [vmem:[#allocation2 + $0xc0] ss:$8 sps:$4 sm:$0xff]   ;;  %v708_v34 = vld [vmem:[#allocation2 + $0xd4] ss:$8 sps:$4 sm:$0xff]   ;;  %v710_v35 = vld [vmem:[#allocation2 + $0xd0] ss:$8 sps:$4 sm:$0xff]  }
  0x1f   :  { %339 = vmatpush1.bf16.msra.mxu1 %v677_v13  ;;  %v711_v36 = vld [vmem:[#allocation2 + $0xe4] ss:$8 sps:$4 sm:$0xff]   ;;  %v713_v37 = vld [vmem:[#allocation2 + $0xe0] ss:$8 sps:$4 sm:$0xff]   ;;  %v714_v38 = vld [vmem:[#allocation2 + $0xf4] ss:$8 sps:$4 sm:$0xff]  }
  0x20   :  { %340 = vmatprep.subr.bf16.mxu1 %v678_v14  ;;  %v716_v39 = vld [vmem:[#allocation2 + $0xf0] ss:$8 sps:$4 sm:$0xff]   ;;  %v717_v40 = vld [vmem:[%s921_s4 + $0x40] sm:$0xff]   ;;  %v719_v42 = vld [vmem:[%s921_s4 + $0x48] sm:$0xff]   ;;  %v166_v0 = vsub.s32 0, %v165_v63  ;;  %v170_v2 = vsub.s32 1, %v165_v63 }
  0x21   :  { %v718_v41 = vld [vmem:[%s921_s4] sm:$0xff]   ;;  %633 = vmatprep.subr.bf16.mxu0 %v717_v40  ;;  %v720_v43 = vld [vmem:[%s921_s4 + $0x8] sm:$0xff]   ;;  %v721_v44 = vld [vmem:[%s921_s4 + $0x50] sm:$0xff]   ;;  %s572_s28 = sshll.u32 %s788_s27, 4  ;;  %vm564_vm4 = vcmask 64512   ;;  %s573_s28 = int_to_ptr.vmem [resolvable:$true] %s572_s28 }
  0x22   :  { %634 = vmatpush3.bf16.msra.mxu0 %v718_v41  ;;  %v722_v45 = vld [vmem:[%s921_s4 + $0x10] sm:$0xff]   ;;  %v723_v46 = vld [vmem:[%s921_s4 + $0x58] sm:$0xff]   ;;  %v725_v48 = vld [vmem:[%s921_s4 + $0x60] sm:$0xff]   ;;  %s755_s29 = scalar_lea.vmem %s573_s28, 128  ;;  %p760_p9 = scmp.lt.s32.totalorder %s573_s28, %s573_s28 }
  0x23   :  { %341 = vmatpush1.bf16.msra.mxu1 %v680_v15  ;;  %635 = vmatprep.subr.bf16.mxu0 %v719_v42  ;;  %v724_v47 = vld [vmem:[%s921_s4 + $0x18] sm:$0xff]   ;;  %v726_v49 = vld [vmem:[%s921_s4 + $0x20] sm:$0xff]   ;;  %v727_v50 = vld [vmem:[%s921_s4 + $0x68] sm:$0xff]   ;;  %p756_p8 = scmp.ne.s32.totalorder %s573_s28, %s755_s29  ;;  %p761_p10 = scmp.lt.s32.totalorder %s755_s29, %s755_s29 }
  0x24   :  { %342 = vmatprep.subr.bf16.mxu1 %v681_v16  ;;  %v728_v51 = vld [vmem:[%s921_s4 + $0x28] sm:$0xff]   ;;  %v729_v58 = vld [vmem:[%s921_s4 + $0x70] sm:$0xff]   ;;  %v731_v60 = vld [vmem:[%s921_s4 + $0x78] sm:$0xff]  }
  0x25   :  { %v730_v59 = vld [vmem:[%s921_s4 + $0x30] sm:$0xff]   ;;  %v732_v61 = vld [vmem:[%s921_s4 + $0x38] sm:$0xff]   ;;  %v162_v1 = vld [vmem:[%s920_s3] sm:$0x3]  ;;  %s786_s3 = smov 112   ;;  %p762_p11 = por %p761_p10, %p760_p9 }
  0x26   :  { %636 = vmatpush3.bf16.msra.mxu0 %v720_v43  ;;  %v167_v3 = vrot.slane %v162_v1, %v166_v0  ;;  %v171_v4 = vrot.slane %v162_v1, %v170_v2 }
  0x27   :  { %343 = vmatpush1.bf16.msra.mxu1 %v683_v17  ;;  %637 = vmatprep.subr.bf16.mxu0 %v721_v44  ;;  %v616_v17 = vld [vmem:[%s922_s5] ss:$0 sm:$0xff]  ;;  %p763_p12 = pnand %p762_p11, %p756_p8 }
  0x28   :  { %344 = vmatprep.subr.bf16.mxu1 %v684_v18 }
  0x2a   :  { %638 = vmatpush3.bf16.msra.mxu0 %v722_v45 }
  0x2b   :  { %345 = vmatpush1.bf16.msra.mxu1 %v686_v19  ;;  %639 = vmatprep.subr.bf16.mxu0 %v723_v46 }
  0x2c   :  { %346 = vmatprep.subr.bf16.mxu1 %v687_v20 }
  0x2e   :  { %640 = vmatpush3.bf16.msra.mxu0 %v724_v47 }
  0x2f   :  { %347 = vmatpush1.bf16.msra.mxu1 %v689_v21  ;;  %641 = vmatprep.subr.bf16.mxu0 %v725_v48 }
  0x30   :  { %348 = vmatprep.subr.bf16.mxu1 %v690_v22 }
  0x32   :  { %642 = vmatpush3.bf16.msra.mxu0 %v726_v49 }
  0x33   :  { %349 = vmatpush1.bf16.msra.mxu1 %v692_v23  ;;  %643 = vmatprep.subr.bf16.mxu0 %v727_v50 }
  0x34   :  { %350 = vmatprep.subr.bf16.mxu1 %v693_v24 }
  0x36   :  { %644 = vmatpush3.bf16.msra.mxu0 %v728_v51 }
  0x37   :  { %351 = vmatpush1.bf16.msra.mxu1 %v695_v25  ;;  %645 = vmatprep.subr.bf16.mxu0 %v729_v58 }
  0x38   :  { %352 = vmatprep.subr.bf16.mxu1 %v696_v26 }
  0x3a   :  { %646 = vmatpush3.bf16.msra.mxu0 %v730_v59 }
  0x3b   :  { %353 = vmatpush1.bf16.msra.mxu1 %v698_v27  ;;  %647 = vmatprep.subr.bf16.mxu0 %v731_v60 }
  0x3c   :  { %354 = vmatprep.subr.bf16.mxu1 %v699_v28 }
  0x3e   :  { %648 = vmatpush3.bf16.msra.mxu0 %v732_v61 }
  0x3f   :  { %355 = vmatpush1.bf16.msra.mxu1 %v701_v29 }
  0x40   :  { %356 = vmatprep.subr.bf16.mxu1 %v702_v30 }
  0x43   :  { %357 = vmatpush1.bf16.msra.mxu1 %v704_v31 }
  0x44   :  { %358 = vmatprep.subr.bf16.mxu1 %v705_v32 }
  0x47   :  { %359 = vmatpush1.bf16.msra.mxu1 %v707_v33 }
  0x48   :  { %360 = vmatprep.subr.bf16.mxu1 %v708_v34 }
  0x4b   :  { %361 = vmatpush1.bf16.msra.mxu1 %v710_v35 }
  0x4c   :  { %362 = vmatprep.subr.bf16.mxu1 %v711_v36 }
  0x4f   :  { %363 = vmatpush1.bf16.msra.mxu1 %v713_v37 }
  0x50   :  { %364 = vmatprep.subr.bf16.mxu1 %v714_v38 }
  0x53   :  { %365 = vmatpush1.bf16.msra.mxu1 %v716_v39 }
  0xee   :  { %v121_v52 = vpop.f32.mrb[0].mxu0 }
  0xef   :  { %v126_v53 = vmax.f32 %v121_v52, 0.0  ;;  %v123_v54 = vpop.f32.mrb[1].mxu0 }
  0xf0   :  { %v127_v55 = vmax.f32 %v123_v54, 0.0 }
  0xf1   :  { %v128_v57 = vpack.c.bf16 %v126_v53, %v126_v53 }
  0xf2   :  { %v129_v56 = vpack.c.bf16 %v127_v55, %v127_v55 }
  0xf4   :  { %366 = vmatprep.mubr.bf16.mxu1 %v129_v56 }
  0xf5   :  { %367 = vmatmul.mubr.bf16.vlgmr.msra.gmra.mrb[0].mxu1 %v128_v57 }
 0x1c8   :  { %v368_v5 = vpop.f32.mrb[0].mxu1 }
 0x1c9   :  { %v369_v6 = vadd.f32 %v368_v5, %v167_v3  ;;  %v370_v7 = vpop.f32.mrb[1].mxu1 }
 0x1ca   :  { %v371_v8 = vadd.f32 %v370_v7, %v171_v4  ;;  %v372_v9 = vpop.f32.mrb[2].mxu1 }
 0x1cb   :  { %v375_v10 = vmax.f32 %v369_v6, 0.0  ;;  %v373_v11 = vpop.f32.mrb[3].mxu1 }
 0x1cc   :  { %v376_v12 = vmax.f32 %v371_v8, 0.0 }
 0x1cd   :  { %v377_v14 = vpack.c.bf16 %v375_v10, %v375_v10 }
 0x1ce   :  { %v378_v13 = vpack.c.bf16 %v376_v12, %v376_v12 }
 0x1d0   :  { %546 = vmatprep.mubr.bf16.mxu0 %v378_v13 }
 0x1d1   :  { %547 = vmatmul.mubr.bf16.vlgmr.msra.gmra.mrb[4].mxu0 %v377_v14 }
 0x2a4   :  { %v649_v15 = vpop.f32.mrb[4].mxu0 }
 0x2a5   :  { %v650_v16 = vpop.f32.mrb[5].mxu0 }
 0x2a6   :  { %v651_v18 = vadd.f32 %v650_v16, %v649_v15  ;;  %v652_v19 = vpop.f32.mrb[6].mxu0 }
 0x2a7   :  { %v653_v20 = vpop.f32.mrb[7].mxu0 }
 0x2a8   :  { %v549_v21 = vadd.f32 %v651_v18, %v616_v17 }
 0x2aa   :  { %555 = vrot.lane.b32.xlu0 %v549_v21, %s786_s3 }
 0x31c   :  { %v556_v22 = vpop.permute.xlu0 %555 }
 0x31d   :  { %v558_v23 = vmul.f32 %v556_v22, %v549_v21 }
 0x31f   :  { %560 = vrot.lane.b32.xlu0 %v558_v23, %s787_s26 }
 0x391   :  { %v561_v24 = vpop.permute.xlu0 %560 }
 0x392   :  { %v563_v25 = vadd.f32 %v561_v24, %v558_v23 }
 0x394   :  { %565 = vst.msk [vmem:[#allocation5] sm:$0xff] %vm564_vm4, %v563_v25 }
 0x395   :  { %766 = shalt.err (!%p763_p12)
}
 0x396   :  { %s767_s7 = scalar_lea.hbm %s923_s6, 128 }
 0x397   :  { %p768_p13 = scmp.ne.s32.totalorder %s923_s6, %s767_s7  ;;  %p771_p0 = scmp.lt.u32.totalorder %s767_s7, %s923_s6 }
 0x399   :  { %p773_p1 = pnand %p771_p0, %p768_p13 }
 0x39b   :  { %776 = shalt.err (!%p773_p1)
}
 0x39c   :  { %575 = dma.vmem_to_hbm [thread:$0]  %s573_s28, 128, %s923_s6, [#allocation4]  }
 0x39d   :  { %779 = dma.done.wait [#allocation4], 128  }
 0x39e   :  { %780 = vsyncadd [#allocation4], 4294967168 }
 0x39f   :  { %579 = vsyncpa [#allocation3], 1 }
 0x3a0   :  { %580 = vsyncpa [#allocation4], 1 }

</bundles_post_ra>
